<compile_context>
chip_gen: v7x
topology: tpu7x:2x2x1
jax: 0.10.0
libtpu: 0.0.40
codegen_flags: <defaults>
</compile_context>

<pallas_src>
import jax
import jax.numpy as jnp
from jax.experimental import pallas as pl
from jax.experimental.pallas import tpu as pltpu

_LANE = 128
_MAX_TILE_M = 8192                # rows of 128 lanes: 4 MiB f32 / 2 MiB bf16 per input block
_VMEM_LIMIT = 48 * 1024 * 1024    # 2 inputs x 2 buffers x 4 MiB + elementwise temporaries


def _round_up(v, m):
    return ((v + m - 1) // m) * m


def _make_ssd_kernel(tile_m, blocks_per_core, m_rows, needs_mask):
    """Sum-of-squared-differences kernel over a (parallel-core, reduction) grid.

    x_ref, t_ref : (tile_m, 128) VMEM tiles of the flattened feature maps
    out_ref      : (8, 128) f32 per-core partial; resident across the inner axis
    """

    def kernel(x_ref, t_ref, out_ref):
        c = pl.program_id(0)          # TensorCore split (parallel axis)
        i = pl.program_id(1)          # sequential reduction over row blocks

        @pl.when(i == 0)
        def _():
            out_ref[...] = jnp.zeros_like(out_ref)

        # Upcast in-kernel (no-op for f32; halves HBM reads for bf16 inputs).
        d = x_ref[...].astype(jnp.float32) - t_ref[...].astype(jnp.float32)

        def accumulate(dd):
            sq = dd * dd
            # (tile_m,128) -> (tile_m//8, 8, 128): each slice is exactly one f32 vreg,
            # so the axis-0 sum is pure VPU vreg adds; out_ref stays one resident vreg
            # (no (tile_m,128) accumulator RMW, no per-step cross-lane reduce).
            out_ref[...] += sq.reshape(tile_m // 8, 8, _LANE).sum(axis=0)

        if needs_mask:
            block_start = (c * blocks_per_core + i) * tile_m
            is_full = block_start + tile_m <= m_rows

            @pl.when(is_full)
            def _():
                accumulate(d)                 # fast path: no mask work on full blocks

            @pl.when(block_start + tile_m > m_rows)
            def _():
                rows = jax.lax.broadcasted_iota(jnp.int32, (tile_m, _LANE), 0)
                # Mask BEFORE squaring/accumulating: the OOB region of an edge /
                # overshoot block is undefined and may contain Inf/NaN.
                accumulate(jnp.where(rows < (m_rows - block_start), d, 0.0))
        else:
            accumulate(d)

    return kernel


def _prepare_slab(arr):
    """Flatten to a lane-dense (m,128) slab plus a <128-element f32 tail.

    Copy-free (pure reshape) when numel % 128 == 0 and dtype is f32/bf16 — no jnp.pad,
    no host-side cast for the supported dtypes.
    """
    flat = arr.reshape(-1)
    if flat.dtype not in (jnp.float32, jnp.bfloat16):
        flat = flat.astype(jnp.float32)
    n = flat.size
    m = n // _LANE
    main = m * _LANE
    if m == 0:
        return None, flat.astype(jnp.float32)
    if main == n:
        return flat.reshape(m, _LANE), None           # free bitcast, no copy
    return flat[:main].reshape(m, _LANE), flat[main:].astype(jnp.float32)


def _ssd_pallas(x_slab, t_slab):
    """sum((x_slab - t_slab)^2) over the whole (m,128) slab, accumulated in f32."""
    m = x_slab.shape[0]
    sub = 16 if (x_slab.dtype == jnp.bfloat16 or t_slab.dtype == jnp.bfloat16) else 8
    tile_m = min(_round_up(m, sub), _MAX_TILE_M)
    blocks_total = pl.cdiv(m, tile_m)
    n_split = 2 if blocks_total >= 2 else 1           # use both TensorCores on v7x
    blocks_per_core = pl.cdiv(blocks_total, n_split)
    covered = n_split * blocks_per_core * tile_m
    needs_mask = covered != m

    kernel = _make_ssd_kernel(tile_m, blocks_per_core, m, needs_mask)

    def in_map(c, i):
        # Clamp so DMAs of overshooting steps stay in bounds; the in-kernel row mask
        # zeroes their contribution.
        return (jnp.minimum(c * blocks_per_core + i, blocks_total - 1), 0)

    bytes_accessed = (x_slab.size * x_slab.dtype.itemsize
                      + t_slab.size * t_slab.dtype.itemsize
                      + n_split * 8 * _LANE * 4)

    partials = pl.pallas_call(
        kernel,
        out_shape=jax.ShapeDtypeStruct((n_split * 8, _LANE), jnp.float32),
        grid_spec=pltpu.PrefetchScalarGridSpec(
            num_scalar_prefetch=0,
            grid=(n_split, blocks_per_core),
            in_specs=[pl.BlockSpec((tile_m, _LANE), in_map),
                      pl.BlockSpec((tile_m, _LANE), in_map)],
            out_specs=pl.BlockSpec((8, _LANE), lambda c, i: (c, 0)),
        ),
        compiler_params=pltpu.CompilerParams(
            dimension_semantics=("parallel", "arbitrary"),
            vmem_limit_bytes=_VMEM_LIMIT),
        cost_estimate=pl.CostEstimate(
            flops=3 * x_slab.size, transcendentals=0, bytes_accessed=bytes_accessed),
    )(x_slab, t_slab)
    # Tiny final reduce (at most 2 KiB of partials) + scale happen in the wrapper.
    return jnp.sum(partials)


def _weighted_mse_value(x, target, weight):
    n = x.size
    x_slab, x_tail = _prepare_slab(x)
    t_slab, t_tail = _prepare_slab(target)
    raw = jnp.float32(0.0)
    if x_slab is not None:
        raw = _ssd_pallas(x_slab, t_slab)
    if x_tail is not None:
        raw = raw + jnp.sum((x_tail - t_tail) ** 2)    # <128-element lane tail, plain jnp
    return raw * (weight / n), raw


@jax.custom_vjp
def weighted_mse(x, target, weight):
    """loss = weight * mean((x - target)^2), computed with the Pallas kernel."""
    return _weighted_mse_value(x, target, weight)[0]


def _weighted_mse_fwd(x, target, weight):
    loss, raw = _weighted_mse_value(x, target, weight)
    return loss, (x, target, weight, raw)


def _weighted_mse_bwd(res, g):
    x, target, weight, raw = res
    n = x.size
    diff = x.astype(jnp.float32) - target.astype(jnp.float32)
    gx = (2.0 * weight / n) * g * diff          # trivial elementwise backward, plain jnp
    gw = (raw / n) * g
    return gx.astype(x.dtype), (-gx).astype(target.dtype), jnp.asarray(gw, jnp.float32)


weighted_mse.defvjp(_weighted_mse_fwd, _weighted_mse_bwd)


def content_loss(x, target, weight):
    """Returns (loss, x) matching ContentLoss.forward (loss stored, x passed through)."""
    assert x.shape == target.shape, (x.shape, target.shape)
    w = jnp.asarray(weight, dtype=jnp.float32)
    return weighted_mse(x, target, w), x


class ContentLoss:
    """JAX/Pallas mirror of the PyTorch ContentLoss module."""

    def __init__(self, target, weight):
        # .detach() equivalent: target is a constant w.r.t. autodiff.
        self.target = jax.lax.stop_gradient(jnp.asarray(target))
        self.weight = jnp.asarray(weight, dtype=jnp.float32)
        self.loss = None
        # Slab prep of the target is now a zero-copy reshape (no pad / no cast for
        # f32/bf16 lane-aligned feature maps), so there is nothing expensive to hoist here.
        # TODO(synk): for ragged (numel % 128 != 0) targets used outside jit, a pre-slabbed
        # target could still save one front-slice copy per forward.

    def forward(self, x):
        self.loss, out = content_loss(x, self.target, self.weight)
        return out

    __call__ = forward


if __name__ == "__main__":
    key = jax.random.PRNGKey(0)
    kx, kt = jax.random.split(key)

    # 1) small CNN feature map (NCHW), single block, lane-aligned
    N, C, H, W = 2, 4, 16, 16
    x = jax.random.normal(kx, (N, C, H, W), dtype=jnp.float32)
    target = jax.random.normal(kt, (N, C, H, W), dtype=jnp.float32)
    weight = 0.75

    module = ContentLoss(target, weight)
    out = module(x)
    loss = jax.block_until_ready(module.loss)
    out = jax.block_until_ready(out)
    ref = weight * jnp.mean((x - target) ** 2)
    assert jnp.allclose(loss, ref, rtol=1e-5, atol=1e-6), (loss, ref)
    assert jnp.array_equal(out, x)

    # 2) ragged shape: edge-block row mask + <128-element tail handled in the wrapper
    shp = (1, 8, 183, 183)
    xb = jax.random.normal(kx, shp, dtype=jnp.float32)
    tb = jax.random.normal(kt, shp, dtype=jnp.float32)
    loss2, _ = content_loss(xb, tb, 2.5)
    ref2 = 2.5 * jnp.mean((xb - tb) ** 2)
    assert jnp.allclose(jax.block_until_ready(loss2), ref2, rtol=1e-4, atol=1e-5), (loss2, ref2)

    # 3) bf16 inputs fed natively (upcast in-kernel, halves HBM reads)
    x16 = x.astype(jnp.bfloat16)
    t16 = target.astype(jnp.bfloat16)
    loss3, out3 = content_loss(x16, t16, weight)
    ref3 = weight * jnp.mean((x16.astype(jnp.float32) - t16.astype(jnp.float32)) ** 2)
    assert jnp.allclose(jax.block_until_ready(loss3), ref3, rtol=1e-4, atol=1e-5), (loss3, ref3)
    assert jnp.array_equal(jax.block_until_ready(out3), x16)

    # 4) multi-block grid exercising the 2-way core split + overshoot masking
    shp4 = (4, 32, 96, 96)   # 1,179,648 elems -> 9216 rows -> 2 blocks of 8192
    x4 = jax.random.normal(kx, shp4, dtype=jnp.float32)
    t4 = jax.random.normal(kt, shp4, dtype=jnp.float32)
    loss4, _ = content_loss(x4, t4, 1.25)
    ref4 = 1.25 * jnp.mean((x4 - t4) ** 2)
    assert jnp.allclose(jax.block_until_ready(loss4), ref4, rtol=1e-4, atol=1e-5), (loss4, ref4)

    # 5) autodiff w.r.t. the input image (the module's intended use in style transfer)
    w = jnp.asarray(weight, dtype=jnp.float32)
    gx = jax.grad(lambda xx: weighted_mse(xx, target, w))(x)
    gref = (2.0 * weight / x.size) * (x - target)
    assert jnp.allclose(jax.block_until_ready(gx), gref, rtol=1e-5, atol=1e-6), "grad mismatch"

    print("KERNEL_OK")
</pallas_src>

<mosaic_0001>
module attributes {stable_mosaic.version = 11 : i64} {
  func.func @kernel(%arg0: i32, %arg1: i32, %arg2: memref<16x128xf32, #tpu.memory_space<vmem>>, %arg3: memref<16x128xf32, #tpu.memory_space<vmem>>, %arg4: memref<8x128xf32, #tpu.memory_space<vmem>>) attributes {dimension_semantics = [#tpu.dimension_semantics<parallel>, #tpu.dimension_semantics<arbitrary>], iteration_bounds = array<i64: 1, 1>, scalar_prefetch = 0 : i64, scratch_operands = 0 : i64, tpu.core_type = #tpu.core_type<tc>, window_params = [{transform_indices = @transform_0, window_bounds = array<i64: 16, 128>}, {transform_indices = @transform_1, window_bounds = array<i64: 16, 128>}, {transform_indices = @transform_2, window_bounds = array<i64: 8, 128>}]} {
    %c0_i32 = arith.constant 0 : i32
    %0 = arith.cmpi eq, %arg1, %c0_i32 : i32
    %1 = arith.extui %0 : i1 to i32
    %c0_i32_0 = arith.constant 0 : i32
    %2 = arith.cmpi ne, %1, %c0_i32_0 : i32
    scf.if %2 {
      %cst_8 = arith.constant 0.000000e+00 : f32
      %12 = vector.broadcast %cst_8 : f32 to vector<8x128xf32>
      %c0_9 = arith.constant 0 : index
      %c0_10 = arith.constant 0 : index
      %13 = vector.load %arg4[%c0_9, %c0_10] : memref<8x128xf32, #tpu.memory_space<vmem>>, vector<8x128xf32>
      tpu.vector_store %arg4[%c0_9, %c0_10], %12 {strides = array<i32>} : memref<8x128xf32, #tpu.memory_space<vmem>>, vector<8x128xf32>,
    } else {
    }
    %c0 = arith.constant 0 : index
    %c0_1 = arith.constant 0 : index
    %3 = vector.load %arg2[%c0, %c0_1] : memref<16x128xf32, #tpu.memory_space<vmem>>, vector<16x128xf32>
    %c0_2 = arith.constant 0 : index
    %c0_3 = arith.constant 0 : index
    %4 = vector.load %arg3[%c0_2, %c0_3] : memref<16x128xf32, #tpu.memory_space<vmem>>, vector<16x128xf32>
    %5 = arith.subf %3, %4 : vector<16x128xf32>
    %6 = arith.mulf %5, %5 : vector<16x128xf32>
    %c0_4 = arith.constant 0 : index
    %c0_5 = arith.constant 0 : index
    %7 = vector.load %arg4[%c0_4, %c0_5] : memref<8x128xf32, #tpu.memory_space<vmem>>, vector<8x128xf32>
    %8 = vector.shape_cast %6 : vector<16x128xf32> to vector<2x8x128xf32>
    %cst = arith.constant dense<0.000000e+00> : vector<8x128xf32>
    %9 = vector.multi_reduction <add>, %8, %cst [0] : vector<2x8x128xf32> to vector<8x128xf32>
    %10 = arith.addf %7, %9 : vector<8x128xf32>
    %c0_6 = arith.constant 0 : index
    %c0_7 = arith.constant 0 : index
    %11 = vector.load %arg4[%c0_6, %c0_7] : memref<8x128xf32, #tpu.memory_space<vmem>>, vector<8x128xf32>
    tpu.vector_store %arg4[%c0_6, %c0_7], %10 {strides = array<i32>} : memref<8x128xf32, #tpu.memory_space<vmem>>, vector<8x128xf32>,
    return
  }
  func.func @transform_0(%arg0: i32, %arg1: i32) -> (i32, i32) {
    %c1_i32 = arith.constant 1 : i32
    %0 = arith.muli %arg0, %c1_i32 : i32
    %1 = arith.addi %0, %arg1 : i32
    %c0_i32 = arith.constant 0 : i32
    %2 = arith.minsi %1, %c0_i32 : i32
    %c0_i32_0 = arith.constant 0 : i32
    %c0_i32_1 = arith.constant 0 : i32
    return %2, %c0_i32_0 : i32, i32
  }
  func.func @transform_1(%arg0: i32, %arg1: i32) -> (i32, i32) {
    %c1_i32 = arith.constant 1 : i32
    %0 = arith.muli %arg0, %c1_i32 : i32
    %1 = arith.addi %0, %arg1 : i32
    %c0_i32 = arith.constant 0 : i32
    %2 = arith.minsi %1, %c0_i32 : i32
    %c0_i32_0 = arith.constant 0 : i32
    %c0_i32_1 = arith.constant 0 : i32
    return %2, %c0_i32_0 : i32, i32
  }
  func.func @transform_2(%arg0: i32, %arg1: i32) -> (i32, i32) {
    %c0_i32 = arith.constant 0 : i32
    %c0_i32_0 = arith.constant 0 : i32
    return %arg0, %c0_i32 : i32, i32
  }
}

</mosaic_0001>

<bundles_post_ra>
// kernel: tpu_custom_call.1
= control target key start
LH: loop header
LB: loop body
LE: loop exit
PB: predicated region body
PF: predicated region fallthrough
CT: control target
= control target key end

     0   :  { %7 = vsyncpa [#allocation3], 0  ;;  %s231_s0 = inlined_call_operand.hbm [shape: f32[16,128], index: 0, kind: input, shape index: {}]   ;;  %s232_s1 = inlined_call_operand.hbm [shape: f32[16,128], index: 1, kind: input, shape index: {}]   ;;  %s233_s2 = inlined_call_operand.hbm [shape: f32[8,128], index: 2, kind: output, shape index: {}]  }
   0x1   :  { %8 = vsyncpa [#allocation6], 0 }
   0x2   :  { %9 = vsyncpa [#allocation4], 0  ;;  %s175_s9 = smov [#allocation2]   ;;  %s103_s13 = scalar_lea.hbm %s231_s0, 256 }
   0x3   :  { %s21_s10 = sshll.u32 %s175_s9, 4  ;;  %p104_p0 = scmp.ne.s32.totalorder %s231_s0, %s103_s13  ;;  %s22_s10 = int_to_ptr.vmem [resolvable:$true] %s21_s10 }
   0x4   :  { %p107_p1 = scmp.lt.u32.totalorder %s103_s13, %s231_s0 }
   0x6   :  { %p109_p2 = pnand %p107_p1, %p104_p0 }
   0x8   :  { %112 = shalt.err (!%p109_p2)
}
   0x9   :  { %s113_s18 = scalar_lea.vmem %s22_s10, 256  ;;  %p118_p4 = scmp.lt.s32.totalorder %s22_s10, %s22_s10 }
   0xa   :  { %p114_p3 = scmp.ne.s32.totalorder %s22_s10, %s113_s18  ;;  %p119_p5 = scmp.lt.s32.totalorder %s113_s18, %s113_s18 }
   0xc   :  { %p120_p6 = por %p119_p5, %p118_p4 }
   0xe   :  { %p121_p7 = pnand %p120_p6, %p114_p3 }
  0x10   :  { %124 = shalt.err (!%p121_p7)
}
  0x11   :  { %s176_s19 = smov 128   ;;  %s177_s20 = smov 8  }
  0x12   :  { %27 = dma.hbm_to_vmem [thread:$0]  %s231_s0, 256, %s22_s10, [#allocation3], %s176_s19, %s176_s19, %s177_s20  }
  0x13   :  { %s178_s23 = smov [#allocation5]   ;;  %s125_s27 = scalar_lea.hbm %s232_s1, 256 }
  0x14   :  { %s39_s24 = sshll.u32 %s178_s23, 4  ;;  %p126_p8 = scmp.ne.s32.totalorder %s232_s1, %s125_s27  ;;  %s40_s24 = int_to_ptr.vmem [resolvable:$true] %s39_s24 }
  0x15   :  { %p129_p9 = scmp.lt.u32.totalorder %s125_s27, %s232_s1 }
  0x17   :  { %p131_p10 = pnand %p129_p9, %p126_p8 }
  0x19   :  { %134 = shalt.err (!%p131_p10)
}
  0x1a   :  { %s135_s4 = scalar_lea.vmem %s40_s24, 256  ;;  %p140_p12 = scmp.lt.s32.totalorder %s40_s24, %s40_s24 }
  0x1b   :  { %p136_p11 = scmp.ne.s32.totalorder %s40_s24, %s135_s4  ;;  %p141_p13 = scmp.lt.s32.totalorder %s135_s4, %s135_s4 }
  0x1d   :  { %p142_p0 = por %p141_p13, %p140_p12 }
  0x1f   :  { %p143_p1 = pnand %p142_p0, %p136_p11 }
  0x21   :  { %146 = shalt.err (!%p143_p1)
}
  0x22   :  { %45 = dma.hbm_to_vmem [thread:$0]  %s232_s1, 256, %s40_s24, [#allocation6], %s176_s19, %s176_s19, %s177_s20  }
  0x23   :  { %169 = dma.done.wait [#allocation3], 256  }
  0x24   :  { %170 = vsyncadd [#allocation3], 4294967040 }
  0x25   :  { %171 = dma.done.wait [#allocation6], 256  }
  0x26   :  { %172 = vsyncadd [#allocation6], 4294967040  ;;  %v65_v0 = vld [vmem:[#allocation2] sm:$0xff]  ;;  %v66_v1 = vld [vmem:[#allocation2 + $0x8] sm:$0xff]  ;;  %s179_s6 = smov [#allocation7]  }
  0x27   :  { %v67_v2 = vld [vmem:[#allocation5] sm:$0xff]  ;;  %v68_v3 = vld [vmem:[#allocation5 + $0x8] sm:$0xff]  ;;  %s83_s7 = sshll.u32 %s179_s6, 4  ;;  %s84_s7 = int_to_ptr.vmem [resolvable:$true] %s83_s7 }
  0x28   :  { %v69_v4 = vsub.f32 %v65_v0, %v67_v2  ;;  %v70_v5 = vsub.f32 %v66_v1, %v68_v3  ;;  %s147_s8 = scalar_lea.vmem %s84_s7, 128  ;;  %p152_p3 = scmp.lt.s32.totalorder %s84_s7, %s84_s7 }
  0x29   :  { %p148_p2 = scmp.ne.s32.totalorder %s84_s7, %s147_s8  ;;  %p153_p4 = scmp.lt.s32.totalorder %s147_s8, %s147_s8 }
  0x2a   :  { %v71_v6 = vmul.f32 %v69_v4, %v69_v4  ;;  %v72_v7 = vmul.f32 %v70_v5, %v70_v5 }
  0x2b   :  { %p154_p5 = por %p153_p4, %p152_p3 }
  0x2c   :  { %v74_v8 = vadd.f32 %v72_v7, %v71_v6 }
  0x2d   :  { %p155_p6 = pnand %p154_p5, %p148_p2 }
  0x2e   :  { %76 = vst [vmem:[#allocation7] sm:$0xff] %v74_v8 }
  0x2f   :  { %158 = shalt.err (!%p155_p6)
}
  0x30   :  { %s159_s10 = scalar_lea.hbm %s233_s2, 128 }
  0x31   :  { %p160_p7 = scmp.ne.s32.totalorder %s233_s2, %s159_s10  ;;  %p163_p8 = scmp.lt.u32.totalorder %s159_s10, %s233_s2 }
  0x33   :  { %p165_p9 = pnand %p163_p8, %p160_p7 }
  0x35   :  { %168 = shalt.err (!%p165_p9)
}
  0x36   :  { %86 = dma.vmem_to_hbm [thread:$0]  %s84_s7, 128, %s233_s2, [#allocation4]  }
  0x37   :  { %173 = dma.done.wait [#allocation4], 128  }
  0x38   :  { %174 = vsyncadd [#allocation4], 4294967168 }
  0x39   :  { %90 = vsyncpa [#allocation3], 1 }
  0x3a   :  { %91 = vsyncpa [#allocation6], 1 }
  0x3b   :  { %92 = vsyncpa [#allocation4], 1 }

</bundles_post_ra>
